<compile_context>
chip_gen: v7x
topology: tpu7x:2x2x1
jax: 0.10.0
libtpu: 0.0.40
codegen_flags: <defaults>
</compile_context>

<pallas_src>
import jax
import jax.numpy as jnp
from jax.experimental import pallas as pl
from jax.experimental.pallas import tpu as pltpu


def _attention_kernel(e1_ref, e2_ref, w_ref, u_ref, out_ref, alpha_ref):
    e1 = e1_ref[...]                          # (bn, F), native dtype (bf16 ok)
    e2 = e2_ref[...]                          # (bn, F)
    w = w_ref[...]                            # (F, D), VMEM-resident
    u = u_ref[...].astype(jnp.float32)        # (1, D)

    # Two back-to-back MXU launches sharing the resident W (no concat copy).
    v1 = jnp.tanh(jnp.dot(e1, w, preferred_element_type=jnp.float32))   # (bn, D)
    s1 = jnp.sum(v1 * u, axis=-1, keepdims=True) + 1e-6                 # (bn, 1)
    v2 = jnp.tanh(jnp.dot(e2, w, preferred_element_type=jnp.float32))
    s2 = jnp.sum(v2 * u, axis=-1, keepdims=True) + 1e-6

    # Softmax over the two views (dim=1 in torch), f32 math.
    m = jnp.maximum(s1, s2)
    a1 = jnp.exp(s1 - m)
    a2 = jnp.exp(s2 - m)
    inv = pl.reciprocal(a1 + a2)              # exact: alpha1 + alpha2 == 1
    alpha1 = a1 * inv
    alpha2 = a2 * inv

    # emb_combined = alpha1*emb1 + alpha2*emb2, computed in the embedding
    # dtype (bf16-native VALU on v6e/v7x; f32 inputs stay f32).
    c1 = alpha1.astype(e1.dtype)
    c2 = alpha2.astype(e2.dtype)
    out_ref[...] = (c1 * e1 + c2 * e2).astype(out_ref.dtype)

    # Tiny side output (8 B/row): two narrow stores, hidden under the
    # HBM-bound main stream.
    alpha_ref[:, 0:1] = alpha1.astype(alpha_ref.dtype)
    alpha_ref[:, 1:2] = alpha2.astype(alpha_ref.dtype)


def _vmem_limit_bytes():
    """Scoped-VMEM request derived from the chip: ~3/4 of physical, capped at
    64 MiB (=> ~48 MiB on v7x's 64 MiB/TC, 64 MiB on v5e/v6e's 128 MiB)."""
    try:
        cap = int(pltpu.get_tpu_info().vmem_capacity_bytes)
    except Exception:
        cap = 64 * 1024 * 1024        # conservative (v7x-sized) fallback
    return min(64 * 1024 * 1024, (cap * 3) // 4)


def _choose_block_n(n, f, d, emb_itemsize, w_itemsize, sublane, vmem_limit):
    """Largest row tile that fits the pipelined VMEM budget.

    Budget model: resident W/u (double-buffered by the pipeline) + per-row
    cost of the double-buffered e1/e2/out streams, the f32 tanh intermediates
    (8*D B/row) and the combine temp, minus headroom for Mosaic scratch."""
    resident = 2 * f * d * w_itemsize + 2 * 8 * max(d, 128) * 4
    headroom = 2 * 1024 * 1024
    budget = max(vmem_limit - resident - headroom, 512 * 1024)
    per_row = 7 * f * emb_itemsize + 8 * d + 96
    cap = max(sublane, budget // per_row)
    block = min(8192, cap)
    # Prefer >=2 grid steps (v7x dual TensorCores) once n is big enough.
    if n > 2 * sublane:
        two_step = -(-n // 2)
        two_step += (-two_step) % sublane
        block = min(block, two_step)
    # Never exceed the (sublane-rounded) problem size.
    block = min(block, n + (-n) % sublane)
    # Lane-align large tiles, sublane-align small ones.
    if block >= 128:
        block = (block // 128) * 128
    else:
        block = (block // sublane) * sublane
    return max(block, sublane)


def attention_layer(emb1, emb2, w_omega, u_omega, *, block_n=None):
    """emb1, emb2: (..., in_feat); w_omega: (in_feat, out_feat); u_omega: (out_feat, 1)."""
    F = w_omega.shape[0]
    D = w_omega.shape[1]
    # torch.squeeze() in the reference collapses stray singleton dims; use an
    # explicit reshape so N == 1 cannot break the (N, F) unpack.
    emb1 = emb1.reshape(-1, F)
    emb2 = emb2.reshape(-1, F)
    N = emb1.shape[0]

    emb_itemsize = jnp.dtype(emb1.dtype).itemsize
    w_itemsize = jnp.dtype(w_omega.dtype).itemsize
    sublane = {4: 8, 2: 16, 1: 32}.get(emb_itemsize, 8)
    vmem_limit = _vmem_limit_bytes()

    if block_n is None:
        block_n = _choose_block_n(N, F, D, emb_itemsize, w_itemsize, sublane,
                                  vmem_limit)
    else:
        block_n = max(sublane, (int(block_n) // sublane) * sublane)

    # Grid sizing: even step count (when >1) so both v7x TensorCores get an
    # equal share under dimension_semantics=("parallel",).
    num_steps = -(-N // block_n)
    if num_steps > 1 and num_steps % 2 == 1:
        num_steps += 1
        new_block = -(-N // num_steps)
        align = 128 if new_block >= 128 else sublane
        new_block += (-new_block) % align
        block_n = max(new_block, sublane)
    Np = num_steps * block_n

    n_pad = Np - N
    if n_pad:
        # Padded zero rows give alpha=0.5 / out=0 and are sliced off below.
        emb1 = jnp.pad(emb1, ((0, n_pad), (0, 0)))
        emb2 = jnp.pad(emb2, ((0, n_pad), (0, 0)))

    u_row = u_omega.reshape(1, D)              # lane-dense copy of u

    out_shapes = (
        jax.ShapeDtypeStruct((Np, F), emb1.dtype),     # emb_combined
        jax.ShapeDtypeStruct((Np, 2), jnp.float32),    # alpha
    )

    grid_spec = pltpu.PrefetchScalarGridSpec(
        num_scalar_prefetch=0,
        grid=(num_steps,),
        in_specs=[
            pl.BlockSpec((block_n, F), lambda i: (i, 0)),
            pl.BlockSpec((block_n, F), lambda i: (i, 0)),
            # W / u use constant index maps: fetched once, VMEM-resident
            # across the whole grid.  (pl.Buffered(1) could reclaim the
            # second W buffer on VMEM-tight configs; the budget model above
            # already charges for both copies.)
            pl.BlockSpec((F, D), lambda i: (0, 0)),
            pl.BlockSpec((1, D), lambda i: (0, 0)),
        ],
        out_specs=[
            pl.BlockSpec((block_n, F), lambda i: (i, 0)),
            pl.BlockSpec((block_n, 2), lambda i: (i, 0)),
        ],
    )

    cost = pl.CostEstimate(
        flops=4 * Np * F * D + 4 * Np * D + 3 * Np * F + 8 * Np,
        transcendentals=2 * Np * D + 3 * Np,
        bytes_accessed=(3 * Np * F * emb_itemsize + 2 * Np * 4
                        + (F * D + D) * w_itemsize),
    )

    out, alpha = pl.pallas_call(
        _attention_kernel,
        out_shape=out_shapes,
        grid_spec=grid_spec,
        compiler_params=pltpu.CompilerParams(
            dimension_semantics=("parallel",),
            vmem_limit_bytes=vmem_limit,
        ),
        cost_estimate=cost,
    )(emb1, emb2, w_omega, u_row)

    if n_pad:
        out = out[:N]
        alpha = alpha[:N]
    return out, alpha


def _xavier_uniform(key, shape, dtype=jnp.float32):
    fan_in, fan_out = shape[0], shape[1]
    bound = (6.0 / (fan_in + fan_out)) ** 0.5
    return jax.random.uniform(key, shape, dtype, minval=-bound, maxval=bound)


def _reference(emb1, emb2, w_omega, u_omega):
    emb = jnp.stack([emb1, emb2], axis=1)                     # (N, 2, F)
    v = jnp.tanh(jnp.einsum("nkf,fd->nkd", emb, w_omega))     # (N, 2, D)
    vu = jnp.einsum("nkd,do->nko", v, u_omega)[..., 0]        # (N, 2)
    alpha = jax.nn.softmax(vu + 1e-6, axis=1)                 # (N, 2)
    out = jnp.einsum("nkf,nk->nf", emb, alpha)                # (N, F)
    return out, alpha


if __name__ == "__main__":
    key = jax.random.PRNGKey(0)
    k1, k2, kw, ku = jax.random.split(key, 4)

    N, in_feat, out_feat = 8, 32, 16

    emb1 = jax.random.normal(k1, (N, in_feat), jnp.float32)
    emb2 = jax.random.normal(k2, (N, in_feat), jnp.float32)
    w_omega = _xavier_uniform(kw, (in_feat, out_feat))
    u_omega = _xavier_uniform(ku, (out_feat, 1))

    out, alpha = attention_layer(emb1, emb2, w_omega, u_omega)
    jax.block_until_ready((out, alpha))

    ref_out, ref_alpha = _reference(emb1, emb2, w_omega, u_omega)
    assert out.shape == (N, in_feat) and alpha.shape == (N, 2)
    assert jnp.allclose(out, ref_out, atol=5e-3, rtol=5e-3), "out mismatch"
    assert jnp.allclose(alpha, ref_alpha, atol=5e-3, rtol=5e-3), "alpha mismatch"

    # Second config exercises the multi-step grid + row-padding path.
    N2 = 40
    e1b = jax.random.normal(k1, (N2, in_feat), jnp.float32)
    e2b = jax.random.normal(k2, (N2, in_feat), jnp.float32)
    out2, alpha2 = attention_layer(e1b, e2b, w_omega, u_omega)
    jax.block_until_ready((out2, alpha2))
    ref_out2, ref_alpha2 = _reference(e1b, e2b, w_omega, u_omega)
    assert out2.shape == (N2, in_feat) and alpha2.shape == (N2, 2)
    assert jnp.allclose(out2, ref_out2, atol=5e-3, rtol=5e-3), "out2 mismatch"
    assert jnp.allclose(alpha2, ref_alpha2, atol=5e-3, rtol=5e-3), "alpha2 mismatch"

    print("KERNEL_OK")
</pallas_src>

<mosaic_0001>
module attributes {stable_mosaic.version = 11 : i64} {
  func.func @_attention_kernel(%arg0: i32, %arg1: memref<8x32xf32, #tpu.memory_space<vmem>>, %arg2: memref<8x32xf32, #tpu.memory_space<vmem>>, %arg3: memref<32x16xf32, #tpu.memory_space<vmem>>, %arg4: memref<1x16xf32, #tpu.memory_space<vmem>>, %arg5: memref<8x32xf32, #tpu.memory_space<vmem>>, %arg6: memref<8x2xf32, #tpu.memory_space<vmem>>) attributes {dimension_semantics = [#tpu.dimension_semantics<parallel>], iteration_bounds = array<i64: 1>, scalar_prefetch = 0 : i64, scratch_operands = 0 : i64, tpu.core_type = #tpu.core_type<tc>, window_params = [{transform_indices = @transform_0, window_bounds = array<i64: 8, 32>}, {transform_indices = @transform_1, window_bounds = array<i64: 8, 32>}, {pipeline_mode = #tpu.pipeline_mode<synchronous>, transform_indices = @transform_2, window_bounds = array<i64: 32, 16>}, {pipeline_mode = #tpu.pipeline_mode<synchronous>, transform_indices = @transform_3, window_bounds = array<i64: 1, 16>}, {transform_indices = @transform_4, window_bounds = array<i64: 8, 32>}, {transform_indices = @transform_5, window_bounds = array<i64: 8, 2>}]} {
    %c0 = arith.constant 0 : index
    %c0_0 = arith.constant 0 : index
    %0 = vector.load %arg1[%c0, %c0_0] : memref<8x32xf32, #tpu.memory_space<vmem>>, vector<8x32xf32>
    %c0_1 = arith.constant 0 : index
    %c0_2 = arith.constant 0 : index
    %1 = vector.load %arg2[%c0_1, %c0_2] : memref<8x32xf32, #tpu.memory_space<vmem>>, vector<8x32xf32>
    %c0_3 = arith.constant 0 : index
    %c0_4 = arith.constant 0 : index
    %2 = vector.load %arg3[%c0_3, %c0_4] : memref<32x16xf32, #tpu.memory_space<vmem>>, vector<32x16xf32>
    %c0_5 = arith.constant 0 : index
    %c0_6 = arith.constant 0 : index
    %3 = vector.load %arg4[%c0_5, %c0_6] : memref<1x16xf32, #tpu.memory_space<vmem>>, vector<1x16xf32>
    %cst = arith.constant dense<0.000000e+00> : vector<8x16xf32>
    %4 = tpu.matmul %0, %2, %cst {dimension_numbers = #tpu.dot_dimension_numbers<[1], [0], [0], [1], [0, 0, 1, 1], [], []>} : vector<8x32xf32>, vector<32x16xf32>, vector<8x16xf32> -> vector<8x16xf32>
    %5 = math.tanh %4 : vector<8x16xf32>
    %6 = vector.broadcast %3 : vector<1x16xf32> to vector<8x16xf32>
    %7 = arith.mulf %5, %6 : vector<8x16xf32>
    %cst_7 = arith.constant dense<0.000000e+00> : vector<8xf32>
    %8 = vector.multi_reduction <add>, %7, %cst_7 [1] : vector<8x16xf32> to vector<8xf32>
    %9 = vector.shape_cast %8 : vector<8xf32> to vector<8x1xf32>
    %cst_8 = arith.constant 9.99999997E-7 : f32
    %10 = vector.broadcast %cst_8 : f32 to vector<8x1xf32>
    %11 = arith.addf %9, %10 : vector<8x1xf32>
    %cst_9 = arith.constant dense<0.000000e+00> : vector<8x16xf32>
    %12 = tpu.matmul %1, %2, %cst_9 {dimension_numbers = #tpu.dot_dimension_numbers<[1], [0], [0], [1], [0, 0, 1, 1], [], []>} : vector<8x32xf32>, vector<32x16xf32>, vector<8x16xf32> -> vector<8x16xf32>
    %13 = math.tanh %12 : vector<8x16xf32>
    %14 = vector.broadcast %3 : vector<1x16xf32> to vector<8x16xf32>
    %15 = arith.mulf %13, %14 : vector<8x16xf32>
    %cst_10 = arith.constant dense<0.000000e+00> : vector<8xf32>
    %16 = vector.multi_reduction <add>, %15, %cst_10 [1] : vector<8x16xf32> to vector<8xf32>
    %17 = vector.shape_cast %16 : vector<8xf32> to vector<8x1xf32>
    %cst_11 = arith.constant 9.99999997E-7 : f32
    %18 = vector.broadcast %cst_11 : f32 to vector<8x1xf32>
    %19 = arith.addf %17, %18 : vector<8x1xf32>
    %20 = arith.maximumf %11, %19 : vector<8x1xf32>
    %21 = arith.subf %11, %20 : vector<8x1xf32>
    %22 = math.exp %21 : vector<8x1xf32>
    %23 = arith.subf %19, %20 : vector<8x1xf32>
    %24 = math.exp %23 : vector<8x1xf32>
    %25 = arith.addf %22, %24 : vector<8x1xf32>
    %26 = tpu.reciprocal %25 : vector<8x1xf32> -> vector<8x1xf32>
    %27 = arith.mulf %22, %26 : vector<8x1xf32>
    %28 = arith.mulf %24, %26 : vector<8x1xf32>
    %29 = vector.broadcast %27 : vector<8x1xf32> to vector<8x32xf32>
    %30 = arith.mulf %29, %0 : vector<8x32xf32>
    %31 = vector.broadcast %28 : vector<8x1xf32> to vector<8x32xf32>
    %32 = arith.mulf %31, %1 : vector<8x32xf32>
    %33 = arith.addf %30, %32 : vector<8x32xf32>
    %c0_12 = arith.constant 0 : index
    %c0_13 = arith.constant 0 : index
    %34 = vector.load %arg5[%c0_12, %c0_13] : memref<8x32xf32, #tpu.memory_space<vmem>>, vector<8x32xf32>
    tpu.vector_store %arg5[%c0_12, %c0_13], %33 {strides = array<i32>} : memref<8x32xf32, #tpu.memory_space<vmem>>, vector<8x32xf32>,
    %c0_14 = arith.constant 0 : index
    %c0_15 = arith.constant 0 : index
    %35 = vector.load %arg6[%c0_14, %c0_15] : memref<8x2xf32, #tpu.memory_space<vmem>>, vector<8x1xf32>
    tpu.vector_store %arg6[%c0_14, %c0_15], %27 {strides = array<i32>} : memref<8x2xf32, #tpu.memory_space<vmem>>, vector<8x1xf32>,
    %c0_16 = arith.constant 0 : index
    %c1 = arith.constant 1 : index
    %36 = vector.load %arg6[%c0_16, %c1] : memref<8x2xf32, #tpu.memory_space<vmem>>, vector<8x1xf32>
    tpu.vector_store %arg6[%c0_16, %c1], %28 {strides = array<i32>} : memref<8x2xf32, #tpu.memory_space<vmem>>, vector<8x1xf32>,
    return
  }
  func.func @transform_0(%arg0: i32) -> (i32, i32) {
    %c0_i32 = arith.constant 0 : i32
    %c0_i32_0 = arith.constant 0 : i32
    return %arg0, %c0_i32 : i32, i32
  }
  func.func @transform_1(%arg0: i32) -> (i32, i32) {
    %c0_i32 = arith.constant 0 : i32
    %c0_i32_0 = arith.constant 0 : i32
    return %arg0, %c0_i32 : i32, i32
  }
  func.func @transform_2(%arg0: i32) -> (i32, i32) {
    %c0_i32 = arith.constant 0 : i32
    %c0_i32_0 = arith.constant 0 : i32
    %c0_i32_1 = arith.constant 0 : i32
    return %c0_i32, %c0_i32_0 : i32, i32
  }
  func.func @transform_3(%arg0: i32) -> (i32, i32) {
    %c0_i32 = arith.constant 0 : i32
    %c0_i32_0 = arith.constant 0 : i32
    %c0_i32_1 = arith.constant 0 : i32
    return %c0_i32, %c0_i32_0 : i32, i32
  }
  func.func @transform_4(%arg0: i32) -> (i32, i32) {
    %c0_i32 = arith.constant 0 : i32
    %c0_i32_0 = arith.constant 0 : i32
    return %arg0, %c0_i32 : i32, i32
  }
  func.func @transform_5(%arg0: i32) -> (i32, i32) {
    %c0_i32 = arith.constant 0 : i32
    %c0_i32_0 = arith.constant 0 : i32
    return %arg0, %c0_i32 : i32, i32
  }
}

</mosaic_0001>

<bundles_post_ra>
// kernel: tpu_custom_call.1
= control target key start
LH: loop header
LB: loop body
LE: loop exit
PB: predicated region body
PF: predicated region fallthrough
CT: control target
= control target key end

     0   :  { %v315_v3 = vmov 0.0|0.0   ;;  %vm316_vm0 = vmmov 0   ;;  %v317_v6 = vmov 0.0   ;;  %s391_s0 = inlined_call_operand.vmem [shape: f32[8,32], index: 0, kind: input, shape index: {}]   ;;  %s392_s1 = inlined_call_operand.vmem [shape: f32[8,32], index: 1, kind: input, shape index: {}]   ;;  %s393_s2 = inlined_call_operand.vmem [shape: f32[32,16], index: 2, kind: input, shape index: {}]   ;;  %s394_s3 = inlined_call_operand.vmem [shape: f32[1,16], index: 3, kind: input, shape index: {}]   ;;  %s395_s4 = inlined_call_operand.hbm [shape: f32[8,32], index: 4, kind: output, shape index: {0}]   ;;  %s396_s5 = inlined_call_operand.vmem [shape: f32[8,2], index: 5, kind: output, shape index: {1}]  }
   0x1   :  { %v22_v0 = vld [vmem:[%s393_s2] sm:$0xff]  ;;  %v23_v1 = vld [vmem:[%s393_s2 + $0x8] sm:$0xff]  ;;  %v24_v2 = vld [vmem:[%s393_s2 + $0x10] sm:$0xff]  ;;  %265 = vmatprep.subr.bf16.mxu0 %v315_v3  ;;  %271 = vmatprep.subr.bf16.mxu1 %v315_v3 }
   0x2   :  { %v266_v4 = vpack.c.bf16 %v23_v1, %v22_v0  ;;  %v25_v5 = vld [vmem:[%s393_s2 + $0x18] sm:$0xff]  ;;  %251 = vmatprep.mubr.msk.f32.mxu0 %vm316_vm0, %v317_v6  ;;  %262 = vmatprep.mubr.msk.f32.mxu1 %vm316_vm0, %v317_v6 }
   0x3   :  { %11 = vsyncpa [#allocation3], 0  ;;  %v269_v7 = vpack.c.bf16 %v25_v5, %v24_v2  ;;  %v20_v8 = vld [vmem:[%s391_s0] sm:$0xff]  ;;  %vm27_vm1 = vcmask 261120   ;;  %vm109_vm2 = vcmask 130048   ;;  %vm208_vm3 = vcmask 7168  }
   0x4   :  { %267 = vmatpush3.bf16.msra.mxu0 %v266_v4  ;;  %273 = vmatpush3.bf16.msra.mxu1 %v266_v4  ;;  %v21_v9 = vld [vmem:[%s392_s1] sm:$0xff]  ;;  %vm210_vm4 = vcmask 15368   ;;  %s318_s0 = smov [#allocation2]  }
   0x5   :  { %268 = vmatprep.subr.bf16.mxu0 %v315_v3  ;;  %274 = vmatprep.subr.bf16.mxu1 %v315_v3  ;;  %v231_v14 = vld [vmem:[%s394_s3] ss:$0 sm:$0xff]  ;;  %s218_s1 = sshll.u32 %s318_s0, 4  ;;  %s219_s1 = int_to_ptr.vmem [resolvable:$true] %s218_s1 }
   0x6   :  { %s291_s9 = scalar_lea.vmem %s219_s1, 128  ;;  %p296_p1 = scmp.lt.s32.totalorder %s219_s1, %s219_s1 }
   0x7   :  { %p292_p0 = scmp.ne.s32.totalorder %s219_s1, %s291_s9  ;;  %p297_p2 = scmp.lt.s32.totalorder %s291_s9, %s291_s9 }
   0x8   :  { %270 = vmatpush3.bf16.msra.mxu0 %v269_v7  ;;  %276 = vmatpush3.bf16.msra.mxu1 %v269_v7 }
   0x9   :  { %p298_p3 = por %p297_p2, %p296_p1 }
   0xb   :  { %252 = vmatmul.mubr.msk.f32.vlgmr.msra.gmra.mrb[0].mxu0 %vm27_vm1, %v20_v8  ;;  %263 = vmatmul.mubr.msk.f32.vlgmr.msra.gmra.mrb[0].mxu1 %vm27_vm1, %v21_v9  ;;  %p299_p4 = pnand %p298_p3, %p292_p0 }
  0xde   :  { %v97_v10 = vpop.f32.mrb[0].mxu0  ;;  %v183_v11 = vpop.f32.mrb[0].mxu1 }
  0xdf   :  { %281 = vtanh.f32 %v97_v10  ;;  %v253_v12 = vpop.f32.mrb[1].mxu0  ;;  %v264_v13 = vpop.f32.mrb[1].mxu1 }
  0xe0   :  { %283 = vtanh.f32 %v183_v11 }
  0xe9   :  { %v282_v15 = vpop.eup %281 }
  0xea   :  { %v284_v16 = vpop.eup %283  ;;  %v108_v17 = vmul.f32 %v282_v15, %v231_v14 }
  0xeb   :  { %v188_v18 = vmul.f32 %v284_v16, %v231_v14 }
  0xec   :  { %v110_v19 = vsel %vm109_vm2, %v108_v17, 0.0 }
  0xed   :  { %111 = vadd.xlane.f32.xlu0 %v110_v19  ;;  %v189_v20 = vsel %vm109_vm2, %v188_v18, 0.0 }
  0xf1   :  { %190 = vadd.xlane.f32.xlu0 %v189_v20 }
 0x17a   :  { %v112_v21 = vpop.xlane.xlu0 %111 }
 0x17b   :  { %v113_v23 = vadd.f32 1e-06, %v112_v21 }
 0x17e   :  { %v191_v22 = vpop.xlane.xlu0 %190 }
 0x17f   :  { %v192_v24 = vadd.f32 1e-06, %v191_v22 }
 0x181   :  { %v193_v25 = vmax.f32 %v113_v23, %v192_v24 }
 0x183   :  { %v194_v26 = vsub.f32 %v113_v23, %v193_v25  ;;  %v197_v27 = vsub.f32 %v192_v24, %v193_v25 }
 0x185   :  { %v195_v28 = vmul.f32 1.442695, %v194_v26  ;;  %v198_v29 = vmul.f32 1.442695, %v197_v27 }
 0x187   :  { %285 = vpow2.f32 %v195_v28 }
 0x188   :  { %287 = vpow2.f32 %v198_v29 }
 0x191   :  { %v286_v30 = vpop.eup %285 }
 0x192   :  { %v288_v31 = vpop.eup %287 }
 0x193   :  { %v200_v32 = vadd.f32 %v288_v31, %v286_v30 }
 0x195   :  { %289 = vrcp.f32 %v200_v32 }
 0x19f   :  { %v290_v33 = vpop.eup %289 }
 0x1a0   :  { %v202_v34 = vmul.f32 %v290_v33, %v286_v30  ;;  %v203_v35 = vmul.f32 %v290_v33, %v288_v31 }
 0x1a2   :  { %v204_v36 = vmul.f32 %v202_v34, %v20_v8  ;;  %v205_v37 = vmul.f32 %v203_v35, %v21_v9  ;;  %209 = vst.msk [vmem:[%s396_s5] sm:$0xff] %vm208_vm3, %v202_v34 }
 0x1a3   :  { %211 = vst.msk [vmem:[%s396_s5] sm:$0xff] %vm210_vm4, %v203_v35 }
 0x1a4   :  { %v206_v38 = vadd.f32 %v205_v37, %v204_v36 }
 0x1a6   :  { %207 = vst.msk [vmem:[#allocation2] sm:$0xff] %vm27_vm1, %v206_v38 }
 0x1a7   :  { %302 = shalt.err (!%p299_p4)
}
 0x1a8   :  { %s303_s12 = scalar_lea.hbm %s395_s4, 128 }
 0x1a9   :  { %p304_p5 = scmp.ne.s32.totalorder %s395_s4, %s303_s12  ;;  %p307_p6 = scmp.lt.u32.totalorder %s303_s12, %s395_s4 }
 0x1ab   :  { %p309_p7 = pnand %p307_p6, %p304_p5 }
 0x1ad   :  { %312 = shalt.err (!%p309_p7)
}
 0x1ae   :  { %221 = dma.vmem_to_hbm [thread:$0]  %s219_s1, 128, %s395_s4, [#allocation3]  }
 0x1af   :  { %313 = dma.done.wait [#allocation3], 128  }
 0x1b0   :  { %314 = vsyncadd [#allocation3], 4294967168 }
 0x1b1   :  { %229 = vsyncpa [#allocation3], 1 }

</bundles_post_ra>
